<compile_context>
chip_gen: v7x
topology: tpu7x:2x2x1
jax: 0.10.0
libtpu: 0.0.40
codegen_flags: <defaults>
</compile_context>

<pallas_src>
from functools import partial

import jax
import jax.numpy as jnp
from jax import lax
from jax.experimental import pallas as pl
from jax.experimental.pallas import tpu as pltpu

MAX_MOVES = 26          # output dim = MAX_MOVES + 1 = 27 (synthetic choice)
HIDDEN = 30             # module default hidden_size
INPUT_SIZE = 32         # chosen small input size

_LANES = 128            # all of D, H, M fit in one lane group
_SUBLANES = 8
_NEG = jnp.float32(-1.0e10)


def _log_sigmoid(x):
    # single-pass numerically stable log(sigmoid(x)) = min(x,0) - log1p(exp(-|x|))
    return jnp.minimum(x, 0.0) - jnp.log1p(jnp.exp(-jnp.abs(x)))


def delphox_kernel(xm_ref, w_ref, b_ref, o_ref):
    xm = xm_ref[...]                       # (8, 128): row0 = x, row1 = mask bias
    b = b_ref[...]                         # (8, 128): row0 = b1, row1 = b2
    maskb = xm[1:2, :]                     # (1, 128) additive mask bias
    b1 = b[0:1, :]
    b2 = b[1:2, :]

    # zero the mask row so only real activation rows feed the MXU (avoids inf*w)
    row = lax.broadcasted_iota(jnp.int32, xm.shape, 0)
    lhs = jnp.where(row == 1, jnp.float32(0.0), xm)

    # L1 + LogSigmoid
    h = jnp.dot(lhs, w_ref[0], preferred_element_type=jnp.float32) + b1
    h = _log_sigmoid(h)
    # L2 + LogSigmoid
    h = jnp.dot(h, w_ref[1], preferred_element_type=jnp.float32) + b2
    h = _log_sigmoid(h)
    # L3 (no bias) + additive mask bias (0 keep, -1e10 masked, -inf padded lanes)
    y = jnp.dot(h, w_ref[2], preferred_element_type=jnp.float32) + maskb

    # softmax over the logits (last axis); exact divide so probs sum to 1
    m = jnp.max(y, axis=-1, keepdims=True)
    e = jnp.exp(y - m)
    denom = jnp.sum(e, axis=-1, keepdims=True)
    o_ref[...] = e / denom


def _pad2(a, rows, cols):
    a = jnp.asarray(a, jnp.float32)
    return jnp.pad(a, ((0, rows - a.shape[0]), (0, cols - a.shape[1])))


def prepare_params(params):
    """Pad + pack parameters ONCE (hoisted out of the per-call path)."""
    w1t, b1, w2t, b2, w3t = params
    H = w1t.shape[1]
    assert w1t.shape[0] <= _LANES and H <= _LANES and w3t.shape[1] <= _LANES
    w_stack = jnp.stack([
        _pad2(w1t, _LANES, _LANES),
        _pad2(w2t, _LANES, _LANES),
        _pad2(w3t, _LANES, _LANES),
    ])                                                        # (3, 128, 128)
    b_stack = jnp.zeros((_SUBLANES, _LANES), jnp.float32)
    b_stack = b_stack.at[0, :H].set(jnp.asarray(b1, jnp.float32))
    b_stack = b_stack.at[1, :H].set(jnp.asarray(b2, jnp.float32))
    return w_stack, b_stack


@jax.jit
def delphox_forward(x, mask, w_stack, b_stack):
    """x: (1, D) f32, mask: (M,) bool. Returns softmax probs of shape (M,)."""
    D = x.shape[-1]
    M = mask.shape[0]

    # per-call packed tile: row 0 = x (zero-padded), row 1 = additive mask bias
    # (0 keep, -1e10 masked, -inf on padded lanes so they drop out of the softmax)
    x_row = jnp.pad(jnp.asarray(x, jnp.float32).reshape(1, D),
                    ((0, 0), (0, _LANES - D)))
    m_row = jnp.pad(jnp.where(mask, _NEG, jnp.float32(0.0)).reshape(1, M),
                    ((0, 0), (0, _LANES - M)), constant_values=-jnp.inf)
    xm = jnp.pad(jnp.concatenate([x_row, m_row], axis=0),
                 ((0, _SUBLANES - 2), (0, 0)))

    vmem = pl.BlockSpec(memory_space=pltpu.MemorySpace.VMEM)

    out = pl.pallas_call(
        delphox_kernel,
        out_shape=jax.ShapeDtypeStruct((_SUBLANES, _LANES), jnp.float32),
        in_specs=[vmem, vmem, vmem],
        out_specs=vmem,
        cost_estimate=pl.CostEstimate(
            flops=3 * 2 * _SUBLANES * _LANES * _LANES,   # ~786 KFLOP
            transcendentals=5 * _SUBLANES * _LANES,
            bytes_accessed=(3 * _LANES * _LANES + 3 * _SUBLANES * _LANES) * 4,
        ),
    )(xm, w_stack, b_stack)

    return out[0, :M]


def init_params(key, input_size=INPUT_SIZE, hidden=HIDDEN, out=MAX_MOVES + 1):
    """Deterministic PyTorch-style uniform init; weights stored pre-transposed."""
    k1, k2, k3, k4, k5 = jax.random.split(key, 5)

    def u(k, shape, fan_in):
        bound = 1.0 / jnp.sqrt(jnp.float32(fan_in))
        return jax.random.uniform(k, shape, jnp.float32, -bound, bound)

    w1t = u(k1, (input_size, hidden), input_size)   # (D, H)
    b1 = u(k2, (hidden,), input_size)
    w2t = u(k3, (hidden, hidden), hidden)           # (H, H)
    b2 = u(k4, (hidden,), hidden)
    w3t = u(k5, (hidden, out), hidden)              # (H, M), no bias (as in module)
    return (w1t, b1, w2t, b2, w3t)


def delphox_reference(x, mask, params):
    """Pure-JAX reference of the PyTorch forward pass."""
    w1t, b1, w2t, b2, w3t = params
    with jax.default_matmul_precision("highest"):
        y = jnp.squeeze(x, axis=0) @ w1t + b1
        y = jax.nn.log_sigmoid(y)
        y = y @ w2t + b2
        y = jax.nn.log_sigmoid(y)
        y = y @ w3t
    y = jnp.where(mask, _NEG, y)
    return jax.nn.softmax(y, axis=0)


# TODO(synk): self.loss (nn.CrossEntropyLoss) is not part of forward(); not implemented.
# TODO(synk): all-moves-masked edge case differs slightly from torch (additive -1e10
#             vs exact replacement); padded lanes are excluded via -inf either way.

if __name__ == "__main__":
    key = jax.random.PRNGKey(0)
    kx, km, kp = jax.random.split(key, 3)

    x = jax.random.normal(kx, (1, INPUT_SIZE), jnp.float32)          # matches x.squeeze(0)
    mask = jax.random.bernoulli(km, 0.3, (MAX_MOVES + 1,))           # bool mask
    params = init_params(kp)

    # padded/packed params are built once and reused for every forward call
    w_stack, b_stack = jax.block_until_ready(prepare_params(params))

    out = delphox_forward(x, mask, w_stack, b_stack)
    out = jax.block_until_ready(out)

    ref = delphox_reference(x, mask, params)
    assert out.shape == (MAX_MOVES + 1,)
    assert jnp.allclose(jnp.sum(out), 1.0, atol=1e-4)
    assert jnp.allclose(out, ref, atol=1e-4, rtol=1e-4)

    print("KERNEL_OK")
</pallas_src>

<mosaic_0001>
module attributes {stable_mosaic.version = 11 : i64} {
  func.func @delphox_kernel(%arg0: memref<8x128xf32, #tpu.memory_space<vmem>>, %arg1: memref<3x128x128xf32, #tpu.memory_space<vmem>>, %arg2: memref<8x128xf32, #tpu.memory_space<vmem>>, %arg3: memref<8x128xf32, #tpu.memory_space<vmem>>) attributes {dimension_semantics = [], scalar_prefetch = 0 : i64, scratch_operands = 0 : i64, tpu.core_type = #tpu.core_type<tc>} {
    %c0 = arith.constant 0 : index
    %c0_0 = arith.constant 0 : index
    %0 = vector.load %arg0[%c0, %c0_0] : memref<8x128xf32, #tpu.memory_space<vmem>>, vector<8x128xf32>
    %c0_1 = arith.constant 0 : index
    %c0_2 = arith.constant 0 : index
    %1 = vector.load %arg2[%c0_1, %c0_2] : memref<8x128xf32, #tpu.memory_space<vmem>>, vector<8x128xf32>
    %2 = vector.extract_strided_slice %0 {offsets = [1, 0], sizes = [1, 128], strides = [1, 1]} : vector<8x128xf32> to vector<1x128xf32>
    %3 = vector.extract_strided_slice %1 {offsets = [0, 0], sizes = [1, 128], strides = [1, 1]} : vector<8x128xf32> to vector<1x128xf32>
    %4 = vector.extract_strided_slice %1 {offsets = [1, 0], sizes = [1, 128], strides = [1, 1]} : vector<8x128xf32> to vector<1x128xf32>
    %5 = tpu.iota {dimensions = array<i32: 0>} : vector<8x128xi32>
    %c1_i32 = arith.constant 1 : i32
    %6 = vector.broadcast %c1_i32 : i32 to vector<8x128xi32>
    %7 = arith.cmpi eq, %5, %6 : vector<8x128xi32>
    %cst = arith.constant 0.000000e+00 : f32
    %8 = vector.broadcast %cst : f32 to vector<8x128xf32>
    %9 = arith.select %7, %8, %0 : vector<8x128xi1>, vector<8x128xf32>
    %c0_3 = arith.constant 0 : index
    %c0_4 = arith.constant 0 : index
    %c0_5 = arith.constant 0 : index
    %10 = vector.load %arg1[%c0_3, %c0_4, %c0_5] : memref<3x128x128xf32, #tpu.memory_space<vmem>>, vector<1x128x128xf32>
    %11 = vector.shape_cast %10 : vector<1x128x128xf32> to vector<128x128xf32>
    %cst_6 = arith.constant dense<0.000000e+00> : vector<8x128xf32>
    %12 = tpu.matmul %9, %11, %cst_6 {dimension_numbers = #tpu.dot_dimension_numbers<[1], [0], [0], [1], [0, 0, 1, 1], [], []>} : vector<8x128xf32>, vector<128x128xf32>, vector<8x128xf32> -> vector<8x128xf32>
    %13 = vector.broadcast %3 : vector<1x128xf32> to vector<8x128xf32>
    %14 = arith.addf %12, %13 : vector<8x128xf32>
    %cst_7 = arith.constant 0.000000e+00 : f32
    %15 = vector.broadcast %cst_7 : f32 to vector<8x128xf32>
    %16 = arith.minimumf %14, %15 : vector<8x128xf32>
    %17 = math.absf %14 : vector<8x128xf32>
    %cst_8 = arith.constant 0.000000e+00 : f32
    %18 = vector.broadcast %cst_8 : f32 to vector<8x128xf32>
    %19 = arith.subf %18, %17 : vector<8x128xf32>
    %20 = math.exp %19 : vector<8x128xf32>
    %21 = math.log1p %20 : vector<8x128xf32>
    %22 = arith.subf %16, %21 : vector<8x128xf32>
    %c1 = arith.constant 1 : index
    %c0_9 = arith.constant 0 : index
    %c0_10 = arith.constant 0 : index
    %23 = vector.load %arg1[%c1, %c0_9, %c0_10] : memref<3x128x128xf32, #tpu.memory_space<vmem>>, vector<1x128x128xf32>
    %24 = vector.shape_cast %23 : vector<1x128x128xf32> to vector<128x128xf32>
    %cst_11 = arith.constant dense<0.000000e+00> : vector<8x128xf32>
    %25 = tpu.matmul %22, %24, %cst_11 {dimension_numbers = #tpu.dot_dimension_numbers<[1], [0], [0], [1], [0, 0, 1, 1], [], []>} : vector<8x128xf32>, vector<128x128xf32>, vector<8x128xf32> -> vector<8x128xf32>
    %26 = vector.broadcast %4 : vector<1x128xf32> to vector<8x128xf32>
    %27 = arith.addf %25, %26 : vector<8x128xf32>
    %cst_12 = arith.constant 0.000000e+00 : f32
    %28 = vector.broadcast %cst_12 : f32 to vector<8x128xf32>
    %29 = arith.minimumf %27, %28 : vector<8x128xf32>
    %30 = math.absf %27 : vector<8x128xf32>
    %cst_13 = arith.constant 0.000000e+00 : f32
    %31 = vector.broadcast %cst_13 : f32 to vector<8x128xf32>
    %32 = arith.subf %31, %30 : vector<8x128xf32>
    %33 = math.exp %32 : vector<8x128xf32>
    %34 = math.log1p %33 : vector<8x128xf32>
    %35 = arith.subf %29, %34 : vector<8x128xf32>
    %c2 = arith.constant 2 : index
    %c0_14 = arith.constant 0 : index
    %c0_15 = arith.constant 0 : index
    %36 = vector.load %arg1[%c2, %c0_14, %c0_15] : memref<3x128x128xf32, #tpu.memory_space<vmem>>, vector<1x128x128xf32>
    %37 = vector.shape_cast %36 : vector<1x128x128xf32> to vector<128x128xf32>
    %cst_16 = arith.constant dense<0.000000e+00> : vector<8x128xf32>
    %38 = tpu.matmul %35, %37, %cst_16 {dimension_numbers = #tpu.dot_dimension_numbers<[1], [0], [0], [1], [0, 0, 1, 1], [], []>} : vector<8x128xf32>, vector<128x128xf32>, vector<8x128xf32> -> vector<8x128xf32>
    %39 = vector.broadcast %2 : vector<1x128xf32> to vector<8x128xf32>
    %40 = arith.addf %38, %39 : vector<8x128xf32>
    %cst_17 = arith.constant dense<0xFF800000> : vector<8xf32>
    %41 = vector.multi_reduction <maximumf>, %40, %cst_17 [1] : vector<8x128xf32> to vector<8xf32>
    %42 = vector.shape_cast %41 : vector<8xf32> to vector<8x1xf32>
    %43 = vector.broadcast %42 : vector<8x1xf32> to vector<8x128xf32>
    %44 = arith.subf %40, %43 : vector<8x128xf32>
    %45 = math.exp %44 : vector<8x128xf32>
    %cst_18 = arith.constant dense<0.000000e+00> : vector<8xf32>
    %46 = vector.multi_reduction <add>, %45, %cst_18 [1] : vector<8x128xf32> to vector<8xf32>
    %47 = vector.shape_cast %46 : vector<8xf32> to vector<8x1xf32>
    %48 = vector.broadcast %47 : vector<8x1xf32> to vector<8x128xf32>
    %49 = arith.divf %45, %48 : vector<8x128xf32>
    %c0_19 = arith.constant 0 : index
    %c0_20 = arith.constant 0 : index
    %50 = vector.load %arg3[%c0_19, %c0_20] : memref<8x128xf32, #tpu.memory_space<vmem>>, vector<8x128xf32>
    tpu.vector_store %arg3[%c0_19, %c0_20], %49 {strides = array<i32>} : memref<8x128xf32, #tpu.memory_space<vmem>>, vector<8x128xf32>,
    return
  }
}

</mosaic_0001>

<bundles_post_ra>
// kernel: delphox_forward.1
= control target key start
LH: loop header
LB: loop body
LE: loop exit
PB: predicated region body
PF: predicated region fallthrough
CT: control target
= control target key end

     0   :  { %8 = vsyncpa [#allocation3], 0  ;;  %s624_s12 = smov [#allocation2]   ;;  %s711_s0 = inlined_call_operand.vmem [shape: f32[8,128], index: 0, kind: input, shape index: {}]   ;;  %s712_s1 = inlined_call_operand.hbm [shape: f32[3,128,128], index: 1, kind: input, shape index: {}]   ;;  %s713_s2 = inlined_call_operand.vmem [shape: f32[8,128], index: 2, kind: input, shape index: {}]   ;;  %s714_s3 = inlined_call_operand.vmem [shape: f32[8,128], index: 3, kind: output, shape index: {}]  }
   0x1   :  { %s16_s13 = sshll.u32 %s624_s12, 4  ;;  %s600_s16 = scalar_lea.hbm %s712_s1, 6144  ;;  %s17_s13 = int_to_ptr.vmem [resolvable:$true] %s16_s13 }
   0x2   :  { %p601_p0 = scmp.ne.s32.totalorder %s712_s1, %s600_s16  ;;  %p604_p1 = scmp.lt.u32.totalorder %s600_s16, %s712_s1 }
   0x4   :  { %p606_p2 = pnand %p604_p1, %p601_p0 }
   0x6   :  { %609 = shalt.err (!%p606_p2)
}
   0x7   :  { %s610_s21 = scalar_lea.vmem %s17_s13, 6144  ;;  %p615_p4 = scmp.lt.s32.totalorder %s17_s13, %s17_s13 }
   0x8   :  { %p611_p3 = scmp.ne.s32.totalorder %s17_s13, %s610_s21  ;;  %p616_p5 = scmp.lt.s32.totalorder %s610_s21, %s610_s21 }
   0xa   :  { %p617_p6 = por %p616_p5, %p615_p4 }
   0xc   :  { %p618_p7 = pnand %p617_p6, %p611_p3 }
   0xe   :  { %621 = shalt.err (!%p618_p7)
}
   0xf   :  { %s625_s22 = smov 128   ;;  %s626_s23 = smov 8  }
  0x10   :  { %22 = dma.hbm_to_vmem [thread:$0]  %s712_s1, 6144, %s17_s13, [#allocation3], %s625_s22, %s625_s22, %s626_s23  }
  0x11   :  { %622 = dma.done.wait [#allocation3], 6144  }
  0x12   :  { %623 = vsyncadd [#allocation3], 4294961152  ;;  %v627_v0 = vmov 0.0|0.0   ;;  %vm628_vm0 = vmmov 0   ;;  %v629_v1 = vmov 0.0   ;;  %v34_v2 = vld [vmem:[#allocation2] sm:$0xff]  ;;  %v30_v23 = vlaneseq }
  0x13   :  { %510 = vmatprep.subr.bf16.mxu0 %v627_v0  ;;  %437 = vmatprep.mubr.msk.f32.mxu0 %vm628_vm0, %v629_v1  ;;  %v35_v3 = vld [vmem:[#allocation2 + $0x8] sm:$0xff]  ;;  %v36_v4 = vld [vmem:[#allocation2 + $0x10] sm:$0xff]  ;;  %v37_v6 = vld [vmem:[#allocation2 + $0x18] sm:$0xff] }
  0x14   :  { %534 = vmatprep.subr.bf16.mxu1 %v627_v0  ;;  %472 = vmatprep.mubr.msk.f32.mxu1 %vm628_vm0, %v629_v1  ;;  %v511_v5 = vpack.c.bf16 %v35_v3, %v34_v2  ;;  %v514_v7 = vpack.c.bf16 %v37_v6, %v36_v4  ;;  %v38_v8 = vld [vmem:[#allocation2 + $0x20] sm:$0xff]  ;;  %v39_v9 = vld [vmem:[#allocation2 + $0x28] sm:$0xff]  ;;  %v40_v11 = vld [vmem:[#allocation2 + $0x30] sm:$0xff]  ;;  %v672_v27 = vshrl.u32 %v30_v23, 7 }
  0x15   :  { %v517_v10 = vpack.c.bf16 %v39_v9, %v38_v8  ;;  %v41_v12 = vld [vmem:[#allocation2 + $0x38] sm:$0xff]  ;;  %v42_v14 = vld [vmem:[#allocation2 + $0x40] sm:$0xff]  ;;  %v43_v15 = vld [vmem:[#allocation2 + $0x48] sm:$0xff] }
  0x16   :  { %512 = vmatpush3.bf16.msra.mxu0 %v511_v5  ;;  %v520_v13 = vpack.c.bf16 %v41_v12, %v40_v11  ;;  %v523_v16 = vpack.c.bf16 %v43_v15, %v42_v14  ;;  %v44_v17 = vld [vmem:[#allocation2 + $0x50] sm:$0xff]  ;;  %v45_v18 = vld [vmem:[#allocation2 + $0x58] sm:$0xff]  ;;  %v46_v20 = vld [vmem:[#allocation2 + $0x60] sm:$0xff]  ;;  %vm353_vm1 = vcmp.ne.s32.totalorder %v672_v27, 1  ;;  %v52_v53 = vsub.s32 0, %v672_v27 }
  0x17   :  { %513 = vmatprep.subr.bf16.mxu0 %v627_v0  ;;  %v526_v19 = vpack.c.bf16 %v45_v18, %v44_v17  ;;  %v47_v21 = vld [vmem:[#allocation2 + $0x68] sm:$0xff]  ;;  %v48_v24 = vld [vmem:[#allocation2 + $0x70] sm:$0xff]  ;;  %v49_v25 = vld [vmem:[#allocation2 + $0x78] sm:$0xff] }
  0x18   :  { %v529_v22 = vpack.c.bf16 %v47_v21, %v46_v20  ;;  %v532_v26 = vpack.c.bf16 %v49_v25, %v48_v24  ;;  %v678_v28 = vld [vmem:[%s711_s0] sm:$0xff]  ;;  %v141_v30 = vld [vmem:[#allocation2 + $0x88] sm:$0xff]  ;;  %v142_v32 = vld [vmem:[#allocation2 + $0x90] sm:$0xff] }
  0x19   :  { %v140_v29 = vld [vmem:[#allocation2 + $0x80] sm:$0xff]  ;;  %v143_v33 = vld [vmem:[#allocation2 + $0x98] sm:$0xff]  ;;  %v145_v36 = vld [vmem:[#allocation2 + $0xa8] sm:$0xff] }
  0x1a   :  { %515 = vmatpush3.bf16.msra.mxu0 %v514_v7  ;;  %v535_v31 = vpack.c.bf16 %v141_v30, %v140_v29  ;;  %v538_v34 = vpack.c.bf16 %v143_v33, %v142_v32  ;;  %v144_v35 = vld [vmem:[#allocation2 + $0xa0] sm:$0xff]  ;;  %v146_v38 = vld [vmem:[#allocation2 + $0xb0] sm:$0xff]  ;;  %v147_v39 = vld [vmem:[#allocation2 + $0xb8] sm:$0xff] }
  0x1b   :  { %516 = vmatprep.subr.bf16.mxu0 %v627_v0  ;;  %v541_v37 = vpack.c.bf16 %v145_v36, %v144_v35  ;;  %v544_v40 = vpack.c.bf16 %v147_v39, %v146_v38  ;;  %v148_v41 = vld [vmem:[#allocation2 + $0xc0] sm:$0xff]  ;;  %v149_v42 = vld [vmem:[#allocation2 + $0xc8] sm:$0xff]  ;;  %v150_v44 = vld [vmem:[#allocation2 + $0xd0] sm:$0xff]  ;;  %v158_v36 = vsub.s32 1, %v672_v27 }
  0x1c   :  { %536 = vmatpush3.bf16.msra.mxu1 %v535_v31  ;;  %v547_v43 = vpack.c.bf16 %v149_v42, %v148_v41  ;;  %v151_v45 = vld [vmem:[#allocation2 + $0xd8] sm:$0xff]  ;;  %v152_v47 = vld [vmem:[#allocation2 + $0xe0] sm:$0xff]  ;;  %v153_v48 = vld [vmem:[#allocation2 + $0xe8] sm:$0xff] }
  0x1d   :  { %537 = vmatprep.subr.bf16.mxu1 %v627_v0  ;;  %v550_v46 = vpack.c.bf16 %v151_v45, %v150_v44  ;;  %v553_v49 = vpack.c.bf16 %v153_v48, %v152_v47  ;;  %v154_v50 = vld [vmem:[#allocation2 + $0xf0] sm:$0xff]  ;;  %v155_v51 = vld [vmem:[#allocation2 + $0xf8] sm:$0xff]  ;;  %v695_v54 = vld [vmem:[%s713_s2] sm:$0xff] }
  0x1e   :  { %518 = vmatpush3.bf16.msra.mxu0 %v517_v10  ;;  %v556_v52 = vpack.c.bf16 %v155_v51, %v154_v50  ;;  %v53_v55 = vrot.slane %v695_v54, %v52_v53  ;;  %v246_v10 = vld [vmem:[#allocation2 + $0x100] sm:$0xff]  ;;  %v247_v11 = vld [vmem:[#allocation2 + $0x108] sm:$0xff]  ;;  %v249_v14 = vld [vmem:[#allocation2 + $0x118] sm:$0xff]  ;;  %v265_v53 = vrot.slane %v678_v28, %v158_v36 }
  0x1f   :  { %519 = vmatprep.subr.bf16.mxu0 %v627_v0  ;;  %v559_v12 = vpack.c.bf16 %v247_v11, %v246_v10  ;;  %v251_v17 = vld [vmem:[#allocation2 + $0x128] sm:$0xff]  ;;  %v253_v20 = vld [vmem:[#allocation2 + $0x138] sm:$0xff]  ;;  %v256_v25 = vld [vmem:[#allocation2 + $0x150] sm:$0xff] }
  0x20   :  { %539 = vmatpush3.bf16.msra.mxu1 %v538_v34  ;;  %v255_v23 = vld [vmem:[#allocation2 + $0x148] sm:$0xff]  ;;  %v258_v30 = vld [vmem:[#allocation2 + $0x160] sm:$0xff]  ;;  %v260_v33 = vld [vmem:[#allocation2 + $0x170] sm:$0xff] }
  0x21   :  { %540 = vmatprep.subr.bf16.mxu1 %v627_v0  ;;  %v259_v31 = vld [vmem:[#allocation2 + $0x168] sm:$0xff]  ;;  %v261_v34 = vld [vmem:[#allocation2 + $0x178] sm:$0xff] }
  0x22   :  { %521 = vmatpush3.bf16.msra.mxu0 %v520_v13  ;;  %v248_v13 = vld [vmem:[#allocation2 + $0x110] sm:$0xff]  ;;  %v577_v32 = vpack.c.bf16 %v259_v31, %v258_v30  ;;  %v580_v35 = vpack.c.bf16 %v261_v34, %v260_v33 }
  0x23   :  { %522 = vmatprep.subr.bf16.mxu0 %v627_v0  ;;  %v562_v15 = vpack.c.bf16 %v249_v14, %v248_v13 }
  0x24   :  { %542 = vmatpush3.bf16.msra.mxu1 %v541_v37  ;;  %v159_v37 = vrot.slane %v695_v54, %v158_v36 }
  0x25   :  { %543 = vmatprep.subr.bf16.mxu1 %v627_v0 }
  0x26   :  { %524 = vmatpush3.bf16.msra.mxu0 %v523_v16  ;;  %v250_v16 = vld [vmem:[#allocation2 + $0x120] sm:$0xff] }
  0x27   :  { %525 = vmatprep.subr.bf16.mxu0 %v627_v0  ;;  %v565_v18 = vpack.c.bf16 %v251_v17, %v250_v16 }
  0x28   :  { %545 = vmatpush3.bf16.msra.mxu1 %v544_v40 }
  0x29   :  { %546 = vmatprep.subr.bf16.mxu1 %v627_v0 }
  0x2a   :  { %527 = vmatpush3.bf16.msra.mxu0 %v526_v19  ;;  %v252_v19 = vld [vmem:[#allocation2 + $0x130] sm:$0xff] }
  0x2b   :  { %528 = vmatprep.subr.bf16.mxu0 %v627_v0  ;;  %v568_v21 = vpack.c.bf16 %v253_v20, %v252_v19 }
  0x2c   :  { %548 = vmatpush3.bf16.msra.mxu1 %v547_v43 }
  0x2d   :  { %549 = vmatprep.subr.bf16.mxu1 %v627_v0 }
  0x2e   :  { %530 = vmatpush3.bf16.msra.mxu0 %v529_v22  ;;  %v254_v22 = vld [vmem:[#allocation2 + $0x140] sm:$0xff] }
  0x2f   :  { %531 = vmatprep.subr.bf16.mxu0 %v627_v0  ;;  %v571_v24 = vpack.c.bf16 %v255_v23, %v254_v22 }
  0x30   :  { %551 = vmatpush3.bf16.msra.mxu1 %v550_v46 }
  0x31   :  { %552 = vmatprep.subr.bf16.mxu1 %v627_v0 }
  0x32   :  { %533 = vmatpush3.bf16.msra.mxu0 %v532_v26  ;;  %v257_v26 = vld [vmem:[#allocation2 + $0x158] sm:$0xff] }
  0x33   :  { %558 = vmatprep.subr.bf16.mxu0 %v627_v0  ;;  %v574_v29 = vpack.c.bf16 %v257_v26, %v256_v25 }
  0x34   :  { %554 = vmatpush3.bf16.msra.mxu1 %v553_v49 }
  0x35   :  { %438 = vmatmul.mubr.msk.f32.vlgmr.msra.gmra.mrb[0].mxu0 %vm353_vm1, %v678_v28  ;;  %555 = vmatprep.subr.bf16.mxu1 %v627_v0 }
  0x36   :  { %507 = vmatprep.mubr.msk.f32.mxu0 %vm628_vm0, %v629_v1  ;;  %560 = vmatpush3.bf16.msra.mxu0 %v559_v12 }
  0x37   :  { %561 = vmatprep.subr.bf16.mxu0 %v627_v0 }
  0x38   :  { %557 = vmatpush3.bf16.msra.mxu1 %v556_v52 }
  0x3a   :  { %563 = vmatpush3.bf16.msra.mxu0 %v562_v15 }
  0x3b   :  { %564 = vmatprep.subr.bf16.mxu0 %v627_v0 }
  0x3e   :  { %566 = vmatpush3.bf16.msra.mxu0 %v565_v18 }
  0x3f   :  { %567 = vmatprep.subr.bf16.mxu0 %v627_v0 }
  0x42   :  { %569 = vmatpush3.bf16.msra.mxu0 %v568_v21 }
  0x43   :  { %570 = vmatprep.subr.bf16.mxu0 %v627_v0 }
  0x46   :  { %572 = vmatpush3.bf16.msra.mxu0 %v571_v24 }
  0x47   :  { %573 = vmatprep.subr.bf16.mxu0 %v627_v0 }
  0x4a   :  { %575 = vmatpush3.bf16.msra.mxu0 %v574_v29 }
  0x4b   :  { %576 = vmatprep.subr.bf16.mxu0 %v627_v0 }
  0x4e   :  { %578 = vmatpush3.bf16.msra.mxu0 %v577_v32 }
  0x4f   :  { %579 = vmatprep.subr.bf16.mxu0 %v627_v0 }
  0x52   :  { %581 = vmatpush3.bf16.msra.mxu0 %v580_v35 }
 0x108   :  { %v120_v56 = vpop.f32.mrb[0].mxu0 }
 0x109   :  { %v121_v57 = vadd.f32 %v120_v56, %v53_v55  ;;  %v439_v58 = vpop.f32.mrb[1].mxu0 }
 0x10b   :  { %v125_v59 = vand.u32 2147483647, %v121_v57  ;;  %v124_v7 = vmin.f32 %v121_v57, 0.0 }
 0x10d   :  { %v126_v60 = vsub.f32 0.0, %v125_v59 }
 0x10f   :  { %v127_v61 = vmul.f32 1.442695, %v126_v60 }
 0x111   :  { %588 = vpow2.f32 %v127_v61 }
 0x11b   :  { %v589_v62 = vpop.eup %588 }
 0x11c   :  { %v129_v63 = vadd.f32 1.0, %v589_v62  ;;  %v132_v1 = vmul.f32 -0.5, %v589_v62  ;;  %v135_v3 = vand.u32 2147483647, %v589_v62 }
 0x11e   :  { %590 = vlog2.f32 %v129_v63  ;;  %v133_v2 = vadd.f32 1.0, %v132_v1  ;;  %vm136_vm2 = vcmp.lt.f32.partialorder %v135_v3, 0.0004427343 }
 0x120   :  { %v134_v6 = vmul.f32 %v589_v62, %v133_v2 }
 0x128   :  { %v591_v4 = vpop.eup %590 }
 0x129   :  { %v131_v5 = vmul.f32 0.6931472, %v591_v4 }
 0x12b   :  { %v137_v8 = vsel %vm136_vm2, %v134_v6, %v131_v5 }
 0x12c   :  { %v138_v9 = vsub.f32 %v124_v7, %v137_v8 }
 0x12e   :  { %473 = vmatmul.mubr.f32.vlgmr.msra.gmra.mrb[0].mxu1 %v138_v9 }
 0x201   :  { %v226_v38 = vpop.f32.mrb[0].mxu1 }
 0x202   :  { %v227_v39 = vadd.f32 %v226_v38, %v159_v37  ;;  %v474_v40 = vpop.f32.mrb[1].mxu1 }
 0x204   :  { %v231_v41 = vand.u32 2147483647, %v227_v39  ;;  %v230_v51 = vmin.f32 %v227_v39, 0.0 }
 0x206   :  { %v232_v42 = vsub.f32 0.0, %v231_v41 }
 0x208   :  { %v233_v43 = vmul.f32 1.442695, %v232_v42 }
 0x20a   :  { %592 = vpow2.f32 %v233_v43 }
 0x214   :  { %v593_v44 = vpop.eup %592 }
 0x215   :  { %v235_v45 = vadd.f32 1.0, %v593_v44  ;;  %v238_v46 = vmul.f32 -0.5, %v593_v44  ;;  %v241_v47 = vand.u32 2147483647, %v593_v44 }
 0x217   :  { %594 = vlog2.f32 %v235_v45  ;;  %v239_v0 = vadd.f32 1.0, %v238_v46  ;;  %vm242_vm3 = vcmp.lt.f32.partialorder %v241_v47, 0.0004427343 }
 0x219   :  { %v240_v50 = vmul.f32 %v593_v44, %v239_v0 }
 0x221   :  { %v595_v48 = vpop.eup %594 }
 0x222   :  { %v237_v49 = vmul.f32 0.6931472, %v595_v48 }
 0x224   :  { %v243_v27 = vsel %vm242_vm3, %v240_v50, %v237_v49 }
 0x225   :  { %v244_v52 = vsub.f32 %v230_v51, %v243_v27 }
 0x227   :  { %508 = vmatmul.mubr.f32.vlgmr.msra.gmra.mrb[2].mxu0 %v244_v52 }
 0x2fa   :  { %v332_v54 = vpop.f32.mrb[2].mxu0 }
 0x2fb   :  { %v333_v55 = vadd.f32 %v332_v54, %v265_v53  ;;  %v509_v56 = vpop.f32.mrb[3].mxu0 }
 0x2fd   :  { %336 = vmax.xlane.f32.xlu0 %v333_v55 }
 0x38a   :  { %v337_v57 = vpop.xlane.xlu0 %336 }
 0x38b   :  { %v338_v58 = vsub.f32 %v333_v55, %v337_v57 }
 0x38d   :  { %v339_v59 = vmul.f32 1.442695, %v338_v58 }
 0x38f   :  { %596 = vpow2.f32 %v339_v59 }
 0x399   :  { %v597_v60 = vpop.eup %596 }
 0x39a   :  { %341 = vadd.xlane.f32.xlu0 %v597_v60 }
 0x427   :  { %v342_v61 = vpop.xlane.xlu0 %341 }
 0x428   :  { %598 = vrcp.f32 %v342_v61 }
 0x432   :  { %v599_v62 = vpop.eup %598 }
 0x433   :  { %v344_v63 = vmul.f32 %v599_v62, %v597_v60 }
 0x435   :  { %345 = vst [vmem:[%s714_s3] sm:$0xff] %v344_v63 }
 0x436   :  { %350 = vsyncpa [#allocation3], 1 }

</bundles_post_ra>
